<compile_context>
chip_gen: v6e
topology: v6e:2x2x1
jax: 0.10.0
libtpu: 0.0.40
codegen_flags: <defaults>
</compile_context>

<pallas_src>
import jax
import jax.numpy as jnp
from jax.experimental import pallas as pl
from jax.experimental.pallas import tpu as pltpu


def _round_up(x, m):
    return ((x + m - 1) // m) * m


def merge_layer_kernel(x_ref, w1_ref, b1_ref, w2_ref, b2_ref, o_ref):
    # Layer 1: single dot over the true (concatenated) feature width,
    # f32 accumulation on the MXU, bias + ReLU in f32 on the VPU.
    h = jnp.dot(x_ref[...], w1_ref[...], preferred_element_type=jnp.float32) + b1_ref[...]
    h = jnp.maximum(h, 0.0)
    # Layer 2: cast the activation back to the bf16 compute dtype for the MXU.
    out = jnp.dot(h.astype(w2_ref.dtype), w2_ref[...],
                  preferred_element_type=jnp.float32) + b2_ref[...]
    o_ref[...] = out.astype(o_ref.dtype)


def _vmem_budget_bytes():
    """0.75 x per-core VMEM capacity; conservative 48 MiB fallback (v7x)."""
    try:
        return int(0.75 * int(pltpu.get_tpu_info().vmem_capacity_bytes))
    except Exception:
        return int(0.75 * 64 * 1024 * 1024)


def _choose_batch_tile(B, block_b, per_row_bytes, weight_bytes, budget):
    """Largest batch tile that fits the VMEM budget; prefer MXU-aligned 256."""
    avail = budget - weight_bytes - (2 << 20)            # slack for misc/pipeline
    tb_cap = max(8, int(avail) // max(per_row_bytes, 1))
    tb = int(min(block_b, tb_cap, _round_up(B, 8)))
    if tb >= 256:
        tb = (tb // 256) * 256                            # match 2x256^2 MXU (128 would suit v5e)
    else:
        tb = max(8, (tb // 8) * 8)
    bp = _round_up(B, tb)
    # Prefer >= 2 grid steps so the "parallel" axis shards across v7x's 2 TCs.
    if bp // tb < 2 and tb > 8:
        tb = max(8, _round_up(tb // 2, 8))
        bp = _round_up(B, tb)
    return tb, bp


def merge_layer(x1, x2, w1, b1, w2, b2, *, block_b=1024,
                compute_dtype=jnp.bfloat16, out_dtype=jnp.float32):
    """Pallas equivalent of MergeLayer.forward(x1, x2).

    x1: [B, dim1], x2: [B, dim2]
    w1: [dim1+dim2, dim3] (fc1.weight transposed), b1: [dim3]
    w2: [dim3, dim4]      (fc2.weight transposed), b2: [dim4]
    """
    B, d1 = x1.shape
    d2 = x2.shape[1]
    d_in, d3 = w1.shape
    d4 = w2.shape[1]
    assert d_in == d1 + d2

    cd = compute_dtype
    csz = jnp.dtype(cd).itemsize
    osz = jnp.dtype(out_dtype).itemsize

    # Lane-dense padded OUTPUT feature dims (one-time weight padding only).
    d3p, d4p = _round_up(d3, 128), _round_up(d4, 128)

    # Per-grid-step VMEM footprint (bytes). Weights counted double-buffered to
    # stay safe even if the Buffered(1) request below is not honored.
    weight_bytes = 2 * (csz * (d_in * d3p + d3p * d4p) + 4 * (d3p + d4p))
    per_row = (2 * csz * d_in          # double-buffered activation tile
               + 2 * osz * d4p         # double-buffered output tile
               + 4 * d3p + 4 * d4p)    # f32 intermediates (h, pre-cast out)
    budget = _vmem_budget_bytes()
    TB, Bp = _choose_batch_tile(B, block_b, per_row, weight_bytes, budget)

    # ---- One fused wrapper op for the activations: concat + cast to bf16.
    # No lane padding (BlockSpec last dim == full array dim is legal).
    x = jnp.concatenate([x1, x2], axis=1).astype(cd)
    if Bp != B:
        x = jnp.pad(x, ((0, Bp - B), (0, 0)))

    # ---- One-time weight/bias padding (exact: zeros through ReLU).
    def pad2(a, r, c):
        return jnp.pad(a, ((0, r - a.shape[0]), (0, c - a.shape[1])))

    w1p = pad2(w1, d_in, d3p).astype(cd)                       # [d_in, d3p]
    w2p = pad2(w2, d3p, d4p).astype(cd)                        # [d3p, d4p]
    b1p = pad2(b1.reshape(1, d3).astype(jnp.float32), 1, d3p)  # [1, d3p]
    b2p = pad2(b2.reshape(1, d4).astype(jnp.float32), 1, d4p)  # [1, d4p]

    grid = (Bp // TB,)

    def make_call(single_buffer_weights):
        wkw = {"pipeline_mode": pl.Buffered(1)} if single_buffer_weights else {}
        in_specs = [
            pl.BlockSpec((TB, d_in), lambda i: (i, 0)),          # activations, pipelined
            pl.BlockSpec((d_in, d3p), lambda i: (0, 0), **wkw),  # resident weights
            pl.BlockSpec((1, d3p), lambda i: (0, 0), **wkw),
            pl.BlockSpec((d3p, d4p), lambda i: (0, 0), **wkw),
            pl.BlockSpec((1, d4p), lambda i: (0, 0), **wkw),
        ]
        return pl.pallas_call(
            merge_layer_kernel,
            out_shape=jax.ShapeDtypeStruct((Bp, d4p), out_dtype),
            grid_spec=pltpu.PrefetchScalarGridSpec(
                num_scalar_prefetch=0,
                grid=grid,
                in_specs=in_specs,
                out_specs=pl.BlockSpec((TB, d4p), lambda i: (i, 0)),
            ),
            compiler_params=pltpu.CompilerParams(
                dimension_semantics=("parallel",),
                vmem_limit_bytes=int(budget),
            ),
        )

    try:
        out = make_call(True)(x, w1p, b1p, w2p, b2p)
    except Exception:
        # pipeline_mode=pl.Buffered(1) not supported by this jax version:
        # fall back to default (double-buffered) specs — still correct.
        out = make_call(False)(x, w1p, b1p, w2p, b2p)

    # Avoid output copies when shapes are already exact.
    if Bp != B:
        out = out[:B]
    if d4p != d4:
        out = out[:, :d4]
    return out


def init_params(key, dim1, dim2, dim3, dim4, dtype=jnp.float32):
    """Matches the torch module's init, weights stored pre-transposed [in, out]."""
    k1, k2, k3, k4 = jax.random.split(key, 4)
    fan_in1, fan_out1 = dim1 + dim2, dim3
    fan_in2, fan_out2 = dim3, dim4

    std1 = (2.0 / (fan_in1 + fan_out1)) ** 0.5
    std2 = (2.0 / (fan_in2 + fan_out2)) ** 0.5
    w1 = std1 * jax.random.normal(k1, (fan_in1, fan_out1), dtype)
    w2 = std2 * jax.random.normal(k2, (fan_in2, fan_out2), dtype)

    bound1 = 1.0 / (fan_in1 ** 0.5)
    bound2 = 1.0 / (fan_in2 ** 0.5)
    b1 = jax.random.uniform(k3, (fan_out1,), dtype, -bound1, bound1)
    b2 = jax.random.uniform(k4, (fan_out2,), dtype, -bound2, bound2)
    return w1, b1, w2, b2


if __name__ == "__main__":
    # Small shapes; intentionally not multiples of 128 to exercise padding paths.
    B, dim1, dim2, dim3, dim4 = 16, 24, 40, 96, 48

    key = jax.random.PRNGKey(0)
    kx1, kx2, kp = jax.random.split(key, 3)
    x1 = jax.random.normal(kx1, (B, dim1), jnp.float32)
    x2 = jax.random.normal(kx2, (B, dim2), jnp.float32)
    w1, b1, w2, b2 = init_params(kp, dim1, dim2, dim3, dim4)

    out = merge_layer(x1, x2, w1, b1, w2, b2)
    out = jax.block_until_ready(out)

    # Pure-JAX reference with the same bf16 operand rounding (f32 accumulation).
    bf = jnp.bfloat16
    x = jnp.concatenate([x1, x2], axis=1)
    h = jnp.maximum(
        jnp.dot(x.astype(bf), w1.astype(bf), preferred_element_type=jnp.float32) + b1,
        0.0)
    ref = jnp.dot(h.astype(bf), w2.astype(bf), preferred_element_type=jnp.float32) + b2

    assert out.shape == (B, dim4)
    assert jnp.allclose(out, ref, atol=1e-2, rtol=1e-2), float(jnp.max(jnp.abs(out - ref)))

    print("KERNEL_OK")
</pallas_src>

<mosaic_0001>
module attributes {stable_mosaic.version = 11 : i64} {
  func.func @merge_layer_kernel(%arg0: i32, %arg1: memref<8x64xbf16, #tpu.memory_space<vmem>>, %arg2: memref<64x128xbf16, #tpu.memory_space<vmem>>, %arg3: memref<1x128xf32, #tpu.memory_space<vmem>>, %arg4: memref<128x128xbf16, #tpu.memory_space<vmem>>, %arg5: memref<1x128xf32, #tpu.memory_space<vmem>>, %arg6: memref<8x128xf32, #tpu.memory_space<vmem>>) attributes {dimension_semantics = [#tpu.dimension_semantics<parallel>], iteration_bounds = array<i64: 2>, scalar_prefetch = 0 : i64, scratch_operands = 0 : i64, tpu.core_type = #tpu.core_type<tc>, window_params = [{transform_indices = @transform_0, window_bounds = array<i64: 8, 64>}, {pipeline_mode = #tpu.pipeline_mode<synchronous>, transform_indices = @transform_1, window_bounds = array<i64: 64, 128>}, {pipeline_mode = #tpu.pipeline_mode<synchronous>, transform_indices = @transform_2, window_bounds = array<i64: 1, 128>}, {pipeline_mode = #tpu.pipeline_mode<synchronous>, transform_indices = @transform_3, window_bounds = array<i64: 128, 128>}, {pipeline_mode = #tpu.pipeline_mode<synchronous>, transform_indices = @transform_4, window_bounds = array<i64: 1, 128>}, {transform_indices = @transform_5, window_bounds = array<i64: 8, 128>}]} {
    %c0 = arith.constant 0 : index
    %c0_0 = arith.constant 0 : index
    %0 = vector.load %arg1[%c0, %c0_0] : memref<8x64xbf16, #tpu.memory_space<vmem>>, vector<8x64xbf16>
    %c0_1 = arith.constant 0 : index
    %c0_2 = arith.constant 0 : index
    %1 = vector.load %arg2[%c0_1, %c0_2] : memref<64x128xbf16, #tpu.memory_space<vmem>>, vector<64x128xbf16>
    %cst = arith.constant dense<0.000000e+00> : vector<8x128xf32>
    %2 = tpu.matmul %0, %1, %cst {dimension_numbers = #tpu.dot_dimension_numbers<[1], [0], [0], [1], [0, 0, 1, 1], [], []>} : vector<8x64xbf16>, vector<64x128xbf16>, vector<8x128xf32> -> vector<8x128xf32>
    %c0_3 = arith.constant 0 : index
    %c0_4 = arith.constant 0 : index
    %3 = vector.load %arg3[%c0_3, %c0_4] : memref<1x128xf32, #tpu.memory_space<vmem>>, vector<1x128xf32>
    %4 = vector.broadcast %3 : vector<1x128xf32> to vector<8x128xf32>
    %5 = arith.addf %2, %4 : vector<8x128xf32>
    %cst_5 = arith.constant 0.000000e+00 : f32
    %6 = vector.broadcast %cst_5 : f32 to vector<8x128xf32>
    %7 = arith.maximumf %5, %6 : vector<8x128xf32>
    %8 = arith.truncf %7 : vector<8x128xf32> to vector<8x128xbf16>
    %c0_6 = arith.constant 0 : index
    %c0_7 = arith.constant 0 : index
    %9 = vector.load %arg4[%c0_6, %c0_7] : memref<128x128xbf16, #tpu.memory_space<vmem>>, vector<128x128xbf16>
    %cst_8 = arith.constant dense<0.000000e+00> : vector<8x128xf32>
    %10 = tpu.matmul %8, %9, %cst_8 {dimension_numbers = #tpu.dot_dimension_numbers<[1], [0], [0], [1], [0, 0, 1, 1], [], []>} : vector<8x128xbf16>, vector<128x128xbf16>, vector<8x128xf32> -> vector<8x128xf32>
    %c0_9 = arith.constant 0 : index
    %c0_10 = arith.constant 0 : index
    %11 = vector.load %arg5[%c0_9, %c0_10] : memref<1x128xf32, #tpu.memory_space<vmem>>, vector<1x128xf32>
    %12 = vector.broadcast %11 : vector<1x128xf32> to vector<8x128xf32>
    %13 = arith.addf %10, %12 : vector<8x128xf32>
    %c0_11 = arith.constant 0 : index
    %c0_12 = arith.constant 0 : index
    %14 = vector.load %arg6[%c0_11, %c0_12] : memref<8x128xf32, #tpu.memory_space<vmem>>, vector<8x128xf32>
    tpu.vector_store %arg6[%c0_11, %c0_12], %13 {strides = array<i32>} : memref<8x128xf32, #tpu.memory_space<vmem>>, vector<8x128xf32>,
    return
  }
  func.func @transform_0(%arg0: i32) -> (i32, i32) {
    %c0_i32 = arith.constant 0 : i32
    %c0_i32_0 = arith.constant 0 : i32
    return %arg0, %c0_i32 : i32, i32
  }
  func.func @transform_1(%arg0: i32) -> (i32, i32) {
    %c0_i32 = arith.constant 0 : i32
    %c0_i32_0 = arith.constant 0 : i32
    %c0_i32_1 = arith.constant 0 : i32
    return %c0_i32, %c0_i32_0 : i32, i32
  }
  func.func @transform_2(%arg0: i32) -> (i32, i32) {
    %c0_i32 = arith.constant 0 : i32
    %c0_i32_0 = arith.constant 0 : i32
    %c0_i32_1 = arith.constant 0 : i32
    return %c0_i32, %c0_i32_0 : i32, i32
  }
  func.func @transform_3(%arg0: i32) -> (i32, i32) {
    %c0_i32 = arith.constant 0 : i32
    %c0_i32_0 = arith.constant 0 : i32
    %c0_i32_1 = arith.constant 0 : i32
    return %c0_i32, %c0_i32_0 : i32, i32
  }
  func.func @transform_4(%arg0: i32) -> (i32, i32) {
    %c0_i32 = arith.constant 0 : i32
    %c0_i32_0 = arith.constant 0 : i32
    %c0_i32_1 = arith.constant 0 : i32
    return %c0_i32, %c0_i32_0 : i32, i32
  }
  func.func @transform_5(%arg0: i32) -> (i32, i32) {
    %c0_i32 = arith.constant 0 : i32
    %c0_i32_0 = arith.constant 0 : i32
    return %arg0, %c0_i32 : i32, i32
  }
}

module attributes {stable_mosaic.version = 11 : i64} {
  func.func @merge_layer_kernel(%arg0: i32, %arg1: memref<8x64xbf16, #tpu.memory_space<vmem>>, %arg2: memref<64x128xbf16, #tpu.memory_space<vmem>>, %arg3: memref<1x128xf32, #tpu.memory_space<vmem>>, %arg4: memref<128x128xbf16, #tpu.memory_space<vmem>>, %arg5: memref<1x128xf32, #tpu.memory_space<vmem>>, %arg6: memref<8x128xf32, #tpu.memory_space<vmem>>) attributes {dimension_semantics = [#tpu.dimension_semantics<parallel>], iteration_bounds = array<i64: 2>, scalar_prefetch = 0 : i64, scratch_operands = 0 : i64, tpu.core_type = #tpu.core_type<tc>, window_params = [{transform_indices = @transform_0, window_bounds = array<i64: 8, 64>}, {pipeline_mode = #tpu.pipeline_mode<synchronous>, transform_indices = @transform_1, window_bounds = array<i64: 64, 128>}, {pipeline_mode = #tpu.pipeline_mode<synchronous>, transform_indices = @transform_2, window_bounds = array<i64: 1, 128>}, {pipeline_mode = #tpu.pipeline_mode<synchronous>, transform_indices = @transform_3, window_bounds = array<i64: 128, 128>}, {pipeline_mode = #tpu.pipeline_mode<synchronous>, transform_indices = @transform_4, window_bounds = array<i64: 1, 128>}, {transform_indices = @transform_5, window_bounds = array<i64: 8, 128>}]} {
    %c0 = arith.constant 0 : index
    %c0_0 = arith.constant 0 : index
    %0 = vector.load %arg1[%c0, %c0_0] : memref<8x64xbf16, #tpu.memory_space<vmem>>, vector<8x64xbf16>
    %c0_1 = arith.constant 0 : index
    %c0_2 = arith.constant 0 : index
    %1 = vector.load %arg2[%c0_1, %c0_2] : memref<64x128xbf16, #tpu.memory_space<vmem>>, vector<64x128xbf16>
    %cst = arith.constant dense<0.000000e+00> : vector<8x128xf32>
    %2 = tpu.matmul %0, %1, %cst {dimension_numbers = #tpu.dot_dimension_numbers<[1], [0], [0], [1], [0, 0, 1, 1], [], []>} : vector<8x64xbf16>, vector<64x128xbf16>, vector<8x128xf32> -> vector<8x128xf32>
    %c0_3 = arith.constant 0 : index
    %c0_4 = arith.constant 0 : index
    %3 = vector.load %arg3[%c0_3, %c0_4] : memref<1x128xf32, #tpu.memory_space<vmem>>, vector<1x128xf32>
    %4 = vector.broadcast %3 : vector<1x128xf32> to vector<8x128xf32>
    %5 = arith.addf %2, %4 : vector<8x128xf32>
    %cst_5 = arith.constant 0.000000e+00 : f32
    %6 = vector.broadcast %cst_5 : f32 to vector<8x128xf32>
    %7 = arith.maximumf %5, %6 : vector<8x128xf32>
    %8 = arith.truncf %7 : vector<8x128xf32> to vector<8x128xbf16>
    %c0_6 = arith.constant 0 : index
    %c0_7 = arith.constant 0 : index
    %9 = vector.load %arg4[%c0_6, %c0_7] : memref<128x128xbf16, #tpu.memory_space<vmem>>, vector<128x128xbf16>
    %cst_8 = arith.constant dense<0.000000e+00> : vector<8x128xf32>
    %10 = tpu.matmul %8, %9, %cst_8 {dimension_numbers = #tpu.dot_dimension_numbers<[1], [0], [0], [1], [0, 0, 1, 1], [], []>} : vector<8x128xbf16>, vector<128x128xbf16>, vector<8x128xf32> -> vector<8x128xf32>
    %c0_9 = arith.constant 0 : index
    %c0_10 = arith.constant 0 : index
    %11 = vector.load %arg5[%c0_9, %c0_10] : memref<1x128xf32, #tpu.memory_space<vmem>>, vector<1x128xf32>
    %12 = vector.broadcast %11 : vector<1x128xf32> to vector<8x128xf32>
    %13 = arith.addf %10, %12 : vector<8x128xf32>
    %c0_11 = arith.constant 0 : index
    %c0_12 = arith.constant 0 : index
    %14 = vector.load %arg6[%c0_11, %c0_12] : memref<8x128xf32, #tpu.memory_space<vmem>>, vector<8x128xf32>
    tpu.vector_store %arg6[%c0_11, %c0_12], %13 {strides = array<i32>} : memref<8x128xf32, #tpu.memory_space<vmem>>, vector<8x128xf32>,
    return
  }
  func.func @transform_0(%arg0: i32) -> (i32, i32) {
    %c0_i32 = arith.constant 0 : i32
    %c0_i32_0 = arith.constant 0 : i32
    return %arg0, %c0_i32 : i32, i32
  }
  func.func @transform_1(%arg0: i32) -> (i32, i32) {
    %c0_i32 = arith.constant 0 : i32
    %c0_i32_0 = arith.constant 0 : i32
    %c0_i32_1 = arith.constant 0 : i32
    return %c0_i32, %c0_i32_0 : i32, i32
  }
  func.func @transform_2(%arg0: i32) -> (i32, i32) {
    %c0_i32 = arith.constant 0 : i32
    %c0_i32_0 = arith.constant 0 : i32
    %c0_i32_1 = arith.constant 0 : i32
    return %c0_i32, %c0_i32_0 : i32, i32
  }
  func.func @transform_3(%arg0: i32) -> (i32, i32) {
    %c0_i32 = arith.constant 0 : i32
    %c0_i32_0 = arith.constant 0 : i32
    %c0_i32_1 = arith.constant 0 : i32
    return %c0_i32, %c0_i32_0 : i32, i32
  }
  func.func @transform_4(%arg0: i32) -> (i32, i32) {
    %c0_i32 = arith.constant 0 : i32
    %c0_i32_0 = arith.constant 0 : i32
    %c0_i32_1 = arith.constant 0 : i32
    return %c0_i32, %c0_i32_0 : i32, i32
  }
  func.func @transform_5(%arg0: i32) -> (i32, i32) {
    %c0_i32 = arith.constant 0 : i32
    %c0_i32_0 = arith.constant 0 : i32
    return %arg0, %c0_i32 : i32, i32
  }
}

</mosaic_0001>

<bundles_post_ra>
// kernel: tpu_custom_call.1
= control target key start
LH: loop header
LB: loop body
LE: loop exit
PB: predicated region body
PF: predicated region fallthrough
CT: control target
= control target key end

     0   :  { %10 = vsyncpa [#allocation3], 0  ;;  %s1103_s0 = inlined_call_operand.hbm [shape: bf16[16,64], index: 0, kind: input, shape index: {}]   ;;  %s1104_s1 = inlined_call_operand.hbm [shape: bf16[64,128], index: 1, kind: input, shape index: {}]   ;;  %s1105_s2 = inlined_call_operand.vmem [shape: f32[1,128], index: 2, kind: input, shape index: {}]   ;;  %s1106_s3 = inlined_call_operand.hbm [shape: bf16[128,128], index: 3, kind: input, shape index: {}]   ;;  %s1107_s4 = inlined_call_operand.vmem [shape: f32[1,128], index: 4, kind: input, shape index: {}]   ;;  %s1108_s5 = inlined_call_operand.hbm [shape: f32[16,128], index: 5, kind: output, shape index: {}]  }
   0x1   :  { %12 = vsyncpa [#allocation3 + $0x1], 0 }
   0x2   :  { %13 = vsyncpa [#allocation6], 0 }
   0x3   :  { %14 = vsyncpa [#allocation4], 0 }
   0x4   :  { %16 = vsyncpa [#allocation4 + $0x1], 0  ;;  %s919_s18 = smov 0   ;;  %s921_s19 = smov 0  }
   0x5   :  { %s923_s20 = smov 0   ;;  %s925_s21 = smov 0  }
   0x6 LB: > { %s940_s22 = sadd.s32 4294967295, %s879_s21   ;;  %s571_s23 = sadd.s32 4294967294, %s879_s21   ;;  %s879_s21 = sphi %s925_s21, %s1130_s21   ;;  %s875_s20 = sphi %s923_s20, %s1129_s20   ;;  %s871_s19 = sphi %s921_s19, %s1128_s19   ;;  %s867_s18 = sphi %s919_s18, %s1127_s18  }
   0x7   : > { %p42_p0 = scmp.ne.s32.totalorder %s871_s19, %s867_s18  ;;  %p1109_p1 = scmp.eq.s32.totalorder %s940_s22, 0 }
   0x8   : > { %p156_p3 = scmp.eq.s32.totalorder %s571_s23, 1  ;;  %p572_p5 = scmp.ge.s32.totalorder %s879_s21, 1 }
   0x9   : > { %p949_p4 = por %p1109_p1, %p42_p0  ;;  %p163_p7 = scmp.lt.s32.totalorder %s879_s21, 3 }
   0xa   : > { %p954_p6 = por %p156_p3, %p42_p0  ;;  %s881_s27 = smov [#allocation5]  }
   0xb   : > { %s1113_s24 = scalar_select %p949_p4, 1, 0 }
   0xc   : > { %s1114_s25 = scalar_select %p954_p6, 1, 0 }
   0xd   : > { %p959_p8 = pnand %p572_p5, %p163_p7  ;;  %s175_s28 = sshll.u32 %s881_s27, 4  ;;  %s176_s28 = int_to_ptr.vmem [resolvable:$true] %s175_s28 }
   0xe   : > { %s882_s30 = smov [#allocation7]   ;;  %s742_s7 = scalar_lea.vmem %s176_s28, 512 }
   0xf   : > { %s1115_s26 = scalar_select %p959_p8, 1, 0 }
  0x10   : > { %p660_p9 = pneg %p959_p8  ;;  %s191_s6 = sshll.u32 %s882_s30, 4  ;;  %s192_s6 = int_to_ptr.vmem [resolvable:$true] %s191_s6 }
  0x11   : > { %p743_p13 = scmp.ne.s32.totalorder %s176_s28, %s742_s7  ;;  %p750_p5 = scmp.lt.s32.totalorder %s176_s28, %s176_s28 }
  0x12   : > { %p968_p11 = pnand %p660_p9, %p1109_p1  ;;  %p751_p7 = scmp.lt.s32.totalorder %s742_s7, %s742_s7 }
  0x14   : > { %p733_p12 = pneg %p968_p11  ;;  %p752_p10 = por %p751_p7, %p750_p5 }
  0x16   : > { %p745_p0 = pnand %p743_p13, %p733_p12 }
  0x18   : > { %p746_p3 = pneg %p745_p0 }
  0x1a   : > { %p753_p9 = pnand %p752_p10, %p746_p3 }
  0x1c   : > { %756 = shalt.err (!%p753_p9)
}
  0x1d   : > { %s883_s8 = smov 64   ;;  %s884_s9 = smov 4  }
  0x1e   : > { %663 = dma.hbm_to_vmem [thread:$0]  (!%p968_p11), %s1104_s1, 512, %s176_s28, [#allocation6], %s883_s8, %s883_s8, %s884_s9  }
  0x1f   : > { %s768_s12 = scalar_lea.vmem %s192_s6, 1024  ;;  %p776_p2 = scmp.lt.s32.totalorder %s192_s6, %s192_s6 }
  0x20   : > { %p769_p1 = scmp.ne.s32.totalorder %s192_s6, %s768_s12  ;;  %p777_p6 = scmp.lt.s32.totalorder %s768_s12, %s768_s12 }
  0x22   : > { %p771_p13 = pnand %p769_p1, %p733_p12  ;;  %p778_p5 = por %p777_p6, %p776_p2 }
  0x24   : > { %p772_p0 = pneg %p771_p13 }
  0x26   : > { %p779_p10 = pnand %p778_p5, %p772_p0 }
  0x28   : > { %782 = shalt.err (!%p779_p10)
}
  0x29   : > { %666 = dma.hbm_to_vmem [thread:$0]  (!%p968_p11), %s1106_s3, 1024, %s192_s6, [#allocation6], %s883_s8, %s883_s8, %s884_s9  }
  0x2a   : > { %s991_s15 = sadd.s32 1, %s879_s21   ;;  %s29_s16 = sadd.s32 1, %s875_s20 }
  0x2b   : > { %s26_s17 = ssub.s32 %s879_s21, %s991_s15  ;;  %p36_p1 = scmp.ne.s32.totalorder %s875_s20, %s871_s19 }
  0x2c   : > { %p27_p2 = scmp.eq.s32.totalorder %s26_s17, 0  ;;  %p37_p6 = scmp.eq.s32.totalorder %s879_s21, 0 }
  0x2d   : > { %p1117_p12 = scmp.eq.s32.totalorder %s940_s22, 1  ;;  %p677_p7 = scmp.lt.s32.totalorder %s879_s21, 2 }
  0x2e   : > { %s1007_s27 = scalar_select %p27_p2, %s875_s20, %s29_s16  }
  0x2f   : > { %p1001_p3 = por %p1117_p12, %p36_p1  ;;  %p38_p9 = por %p37_p6, %p36_p1 }
  0x30   : > { %s208_s28 = sand.u32 1, %s875_s20   ;;  %s577_s30 = sshll.u32 %s879_s21, 6 }
  0x31   : > { %s1118_s23 = scalar_select %p1001_p3, 1, 0 }
  0x32   : > { %s576_s29 = sshll.u32 %s208_s28, 2  ;;  %s1014_s8 = scalar_lea.hbm %s1103_s0, %s577_s30 }
  0x33   : > { %s212_s9 = scalar_lea.vmem [#allocation2], %s576_s29  ;;  %p1016_p11 = pnand %p677_p7, %p38_p9 }
  0x34   : > { %s219_s10 = sshll.u32 %s212_s9, 4  ;;  %s209_s12 = scalar_lea.sflag [#allocation3], %s208_s28  ;;  %s220_s10 = int_to_ptr.vmem [resolvable:$true] %s219_s10 }
  0x35   : > { %s783_s13 = scalar_lea.hbm %s1014_s8, 64  ;;  %p785_p0 = pneg %p1016_p11 }
  0x36   : > { %p784_p13 = scmp.ne.s32.totalorder %s1014_s8, %s783_s13  ;;  %s788_s17 = scalar_lea.hbm %s1103_s0, 128 }
  0x37   : > { %p789_p1 = scmp.lt.s32.totalorder %s1014_s8, %s1103_s0  ;;  %p790_p2 = scmp.lt.s32.totalorder %s788_s17, %s783_s13 }
  0x38   : > { %p786_p5 = pnand %p785_p0, %p784_p13 }
  0x39   : > { %p791_p6 = por %p790_p2, %p789_p1 }
  0x3a   : > { %p787_p10 = pneg %p786_p5 }
  0x3c   : > { %p792_p12 = pnand %p791_p6, %p787_p10 }
  0x3e   : > { %795 = shalt.err (!%p792_p12)
}
  0x3f   : > { %s796_s6 = scalar_lea.vmem %s220_s10, 64  ;;  %s885_s28 = smov [#allocation2]  }
  0x40   : > { %p797_p7 = scmp.ne.s32.totalorder %s220_s10, %s796_s6  ;;  %s801_s7 = sshll.u32 %s885_s28, 4  ;;  %s802_s7 = int_to_ptr.vmem [resolvable:$false] %s801_s7 }
  0x41   : > { %s803_s9 = scalar_lea.vmem %s802_s7, 128  ;;  %p804_p13 = scmp.lt.s32.totalorder %s220_s10, %s802_s7 }
  0x42   : > { %p799_p9 = pnand %p797_p7, %p785_p0  ;;  %p805_p5 = scmp.lt.s32.totalorder %s803_s9, %s796_s6 }
  0x44   : > { %p800_p3 = pneg %p799_p9  ;;  %p806_p4 = por %p805_p5, %p804_p13 }
  0x46   : > { %p807_p8 = pnand %p806_p4, %p800_p3 }
  0x48   : > { %810 = shalt.err (!%p807_p8)
}
  0x49   : > { %670 = dma.hbm_to_vmem [thread:$0]  (!%p1016_p11), %s1014_s8, 64, %s220_s10, %s209_s12  }
  0x4a   : > { %p1120_p10 = scmp.ne.s32.totalorder %s1115_s26, 0 }
  0x4b   : > { %s1037_s13 = sand.u32 (!%p1120_p10), 1, %s871_s19   ;;  %p1121_p0 = scmp.ne.s32.totalorder (!%p1120_p10), %s1113_s24, 0 }
  0x4c   : > { %228 = sbr.rel (%p1120_p10) target bundleno = 511 (0x1ff), region = 40  ;;  %s579_s14 = sshll.u32 (!%p1120_p10), %s1037_s13, 2 }
  0x4d   : > { %s231_s16 = scalar_lea.sflag (!%p1120_p10), [#allocation3], %s1037_s13  ;;  %s234_s17 = scalar_lea.vmem (!%p1120_p10), [#allocation2], %s579_s14 }
  0x51   : > { %854 = dma.done.wait (%p1121_p0), %s231_s16, 64  }
  0x52   : > { %856 = vsyncadd (%p1121_p0), %s231_s16, 4294967232  ;;  %p1122_p4 = scmp.eq.s32.totalorder %s940_s22, 0 }
  0x54   : > { %858 = dma.done.wait (%p1122_p4), [#allocation6], 1536   ;;  %p1123_p8 = pmov %p1122_p4 }
  0x55   : > { %v886_v0 = vmov 0.0   ;;  %vm887_vm0 = vmmov 0   ;;  %v719_v1 = vld [vmem:[#allocation5 + $0x18] sm:$0xff]   ;;  %v720_v2 = vld [vmem:[#allocation5 + $0x10] sm:$0xff]   ;;  %v721_v4 = vld [vmem:[#allocation5 + $0x8] sm:$0xff]   ;;  %vm310_vm1 = vcmask 523264  }
  0x56   : > { %860 = vsyncadd (%p1123_p8), [#allocation6], 4294965760  ;;  %616 = vmatprep.subr.bf16.mxu0 %v886_v0  ;;  %624 = vmatprep.mubr.msk.bf16.mxu0 %vm887_vm0, %v886_v0  ;;  %v723_v3 = vld [vmem:[#allocation7 + $0x38] sm:$0xff]   ;;  %v724_v5 = vld [vmem:[#allocation7 + $0x30] sm:$0xff]   ;;  %s582_s8 = sshll.u32 %s1037_s13, 3  ;;  %s599_s12 = sshll.u32 %s940_s22, 7 }
  0x57   : > { %628 = vmatprep.subr.bf16.mxu1 %v886_v0  ;;  %644 = vmatprep.mubr.msk.bf16.mxu1 %vm887_vm0, %v886_v0  ;;  %v722_v6 = vld [vmem:[#allocation5] sm:$0xff]   ;;  %v725_v7 = vld [vmem:[#allocation7 + $0x28] sm:$0xff]   ;;  %v270_v8 = vld [vmem:[%s234_s17] sm:$0xf]  ;;  %s268_s30 = scalar_lea.vmem [#allocation8], %s582_s8  ;;  %s1060_s7 = scalar_lea.hbm %s1108_s5, %s599_s12 }
  0x58   : > { %617 = vmatpush3.bf16.msra.mxu0 %v719_v1  ;;  %629 = vmatpush3.bf16.msra.mxu1 %v723_v3  ;;  %v726_v9 = vld [vmem:[#allocation7 + $0x20] sm:$0xff]   ;;  %v727_v10 = vld [vmem:[#allocation7 + $0x18] sm:$0xff]   ;;  %v728_v11 = vld [vmem:[#allocation7 + $0x10] sm:$0xff]   ;;  %s482_s29 = sshll.u32 %s268_s30, 4  ;;  %s469_s9 = scalar_lea.sflag [#allocation4], %s1037_s13  ;;  %s1062_s29 = int_to_ptr.vmem [resolvable:$true] %s482_s29 }
  0x59   : > { %618 = vmatprep.subr.bf16.mxu0 %v886_v0  ;;  %630 = vmatprep.subr.bf16.mxu1 %v886_v0  ;;  %v729_v12 = vld [vmem:[#allocation7 + $0x8] sm:$0xff]   ;;  %v730_v13 = vld [vmem:[#allocation7] sm:$0xff]   ;;  %v583_v14 = vld [vmem:[%s1105_s2] ss:$0 sm:$0xff]  ;;  %s811_s14 = scalar_lea.vmem %s1062_s29, 128  ;;  %p1124_p11 = scmp.ne.s32.totalorder %s1118_s23, 0 }
  0x5a   : > { %v589_v22 = vld [vmem:[%s1107_s4] ss:$0 sm:$0xff]  ;;  %p812_p3 = scmp.ne.s32.totalorder %s1062_s29, %s811_s14  ;;  %s888_s22 = smov [#allocation8]  }
  0x5b   : > { %s815_s16 = sshll.u32 %s888_s22, 4  ;;  %s816_s16 = int_to_ptr.vmem [resolvable:$false] %s815_s16 }
  0x5c   : > { %619 = vmatpush3.bf16.msra.mxu0 %v720_v2  ;;  %631 = vmatpush3.bf16.msra.mxu1 %v724_v5  ;;  %p813_p1 = pnand %p812_p3, %p1124_p11  ;;  %s817_s17 = scalar_lea.vmem %s816_s16, 256 }
  0x5d   : > { %620 = vmatprep.subr.bf16.mxu0 %v886_v0  ;;  %632 = vmatprep.subr.bf16.mxu1 %v886_v0  ;;  %p818_p6 = scmp.lt.s32.totalorder %s1062_s29, %s816_s16  ;;  %p819_p12 = scmp.lt.s32.totalorder %s817_s17, %s811_s14 }
  0x5e   : > { %p814_p2 = pneg %p813_p1 }
  0x5f   : > { %p820_p7 = por %p819_p12, %p818_p6 }
  0x60   : > { %621 = vmatpush3.bf16.msra.mxu0 %v721_v4  ;;  %633 = vmatpush3.bf16.msra.mxu1 %v725_v7 }
  0x61   : > { %622 = vmatprep.subr.bf16.mxu0 %v886_v0  ;;  %634 = vmatprep.subr.bf16.mxu1 %v886_v0  ;;  %p821_p9 = pnand %p820_p7, %p814_p2 }
  0x64   : > { %623 = vmatpush3.bf16.msra.mxu0 %v722_v6  ;;  %635 = vmatpush3.bf16.msra.mxu1 %v726_v9 }
  0x65   : > { %636 = vmatprep.subr.bf16.mxu1 %v886_v0 }
  0x67   : > { %625 = vmatmul.mubr.msk.bf16.vlgmr.msra.gmra.mxu0 %vm310_vm1, %v270_v8 }
  0x68   : > { %637 = vmatpush3.bf16.msra.mxu1 %v727_v10 }
  0x69   : > { %638 = vmatprep.subr.bf16.mxu1 %v886_v0 }
  0x6c   : > { %639 = vmatpush3.bf16.msra.mxu1 %v728_v11 }
  0x6d   : > { %640 = vmatprep.subr.bf16.mxu1 %v886_v0 }
  0x70   : > { %641 = vmatpush3.bf16.msra.mxu1 %v729_v12 }
  0x71   : > { %642 = vmatprep.subr.bf16.mxu1 %v886_v0 }
  0x74   : > { %643 = vmatpush3.bf16.msra.mxu1 %v730_v13 }
 0x127   : > { %v348_v15 = vpop.f32.mrf.mxu0 }
 0x128   : > { %v349_v16 = vadd.f32 %v583_v14, %v348_v15 }
 0x129   : > { %v626_v17 = vpop.f32.mrf.mxu0 }
 0x12a   : > { %v354_v18 = vmax.f32 %v349_v16, 0.0 }
 0x12b   : > { %v351_v19 = vpop.f32.mrf.mxu0 }
 0x12c   : > { %v355_v20 = vpack.c.bf16 %v354_v18, %v354_v18 }
 0x12d   : > { %v627_v21 = vpop.f32.mrf.mxu0 }
 0x12e   : > { %645 = vmatmul.mubr.bf16.vlgmr.msra.gmra.mxu1 %v355_v20 }
 0x1ee   : > { %v461_v23 = vpop.f32.mrf.mxu1 }
 0x1ef   : > { %v462_v24 = vadd.f32 %v589_v22, %v461_v23 }
 0x1f0   : > { %v646_v25 = vpop.f32.mrf.mxu1 }
 0x1f1   : > { %467 = vst [vmem:[%s268_s30] sm:$0xff] %v462_v24 }
 0x1f2   : > { %v464_v26 = vpop.f32.mrf.mxu1 }
 0x1f3   : > { %824 = shalt.err (!%p821_p9)
}
 0x1f4   : > { %s825_s24 = scalar_lea.hbm %s1060_s7, 128  ;;  %s829_s8 = scalar_lea.hbm %s1108_s5, 256 }
 0x1f5   : > { %p826_p13 = scmp.ne.s32.totalorder %s1060_s7, %s825_s24  ;;  %p830_p0 = scmp.lt.s32.totalorder %s1060_s7, %s1108_s5 }
 0x1f6   : > { %p831_p4 = scmp.lt.s32.totalorder %s829_s8, %s825_s24 }
 0x1f7   : > { %p827_p5 = pnand %p826_p13, %p1124_p11 }
 0x1f8   : > { %p832_p8 = por %p831_p4, %p830_p0 }
 0x1f9   : > { %p828_p10 = pneg %p827_p5 }
 0x1fb   : > { %p833_p3 = pnand %p832_p8, %p828_p10 }
 0x1fd   : > { %836 = shalt.err (!%p833_p3)
}
 0x1fe   : > { %658 = dma.vmem_to_hbm [thread:$0]  (%p1124_p11), %s1062_s29, 128, %s1060_s7, %s469_s9   ;;  %v647_v27 = vpop.f32.mrf.mxu1 }
 0x1ff PF: > { %s494_s12 = sand.u32 1, %s867_s18   ;;  %p1125_p1 = scmp.ne.s32.totalorder %s1114_s25, 0 }
 0x200   : > { %p1126_p2 = scmp.ge.s32.totalorder %s879_s21, 2  ;;  %s495_s30 = scalar_lea.sflag [#allocation4], %s494_s12 }
 0x202   : > { %p672_p6 = pnand %p1126_p2, %p1125_p1 }
 0x204   : > { %p673_p12 = pneg %p672_p6 }
 0x206   : > { %862 = dma.done.wait (%p673_p12), %s495_s30, 128  }
 0x207   : > { %864 = vsyncadd (%p673_p12), %s495_s30, 4294967168  ;;  %p19_p7 = scmp.ge.s32.totalorder %s991_s15, 4   ;;  %s1127_s18 = smov %s871_s19 }
 0x208   : > { %s1128_s19 = smov %s875_s20  ;;  %s1129_s20 = smov %s1007_s27 }
 0x209   : > { %s1130_s21 = smov %s991_s15  ;;  %21 = sbr.rel (!%p19_p7) target bundleno = 6 (0x6), region = 93 }
 0x20e   :  { %500 = vsyncpa [#allocation3], 1 }
 0x20f   :  { %502 = vsyncpa [#allocation3 + $0x1], 1 }
 0x210   :  { %503 = vsyncpa [#allocation6], 1 }
 0x211   :  { %504 = vsyncpa [#allocation4], 1 }
 0x212   :  { %506 = vsyncpa [#allocation4 + $0x1], 1 }

// kernel: tpu_custom_call.1
= control target key start
LH: loop header
LB: loop body
LE: loop exit
PB: predicated region body
PF: predicated region fallthrough
CT: control target
= control target key end

     0   :  { %10 = vsyncpa [#allocation3], 0  ;;  %s1103_s0 = inlined_call_operand.hbm [shape: bf16[16,64], index: 0, kind: input, shape index: {}]   ;;  %s1104_s1 = inlined_call_operand.hbm [shape: bf16[64,128], index: 1, kind: input, shape index: {}]   ;;  %s1105_s2 = inlined_call_operand.vmem [shape: f32[1,128], index: 2, kind: input, shape index: {}]   ;;  %s1106_s3 = inlined_call_operand.hbm [shape: bf16[128,128], index: 3, kind: input, shape index: {}]   ;;  %s1107_s4 = inlined_call_operand.vmem [shape: f32[1,128], index: 4, kind: input, shape index: {}]   ;;  %s1108_s5 = inlined_call_operand.hbm [shape: f32[16,128], index: 5, kind: output, shape index: {}]  }
   0x1   :  { %12 = vsyncpa [#allocation3 + $0x1], 0 }
   0x2   :  { %13 = vsyncpa [#allocation6], 0 }
   0x3   :  { %14 = vsyncpa [#allocation4], 0 }
   0x4   :  { %16 = vsyncpa [#allocation4 + $0x1], 0  ;;  %s919_s18 = smov 0   ;;  %s921_s19 = smov 0  }
   0x5   :  { %s923_s20 = smov 0   ;;  %s925_s21 = smov 0  }
   0x6 LB: > { %s940_s22 = sadd.s32 4294967295, %s879_s21   ;;  %s571_s23 = sadd.s32 4294967294, %s879_s21   ;;  %s879_s21 = sphi %s925_s21, %s1130_s21   ;;  %s875_s20 = sphi %s923_s20, %s1129_s20   ;;  %s871_s19 = sphi %s921_s19, %s1128_s19   ;;  %s867_s18 = sphi %s919_s18, %s1127_s18  }
   0x7   : > { %p42_p0 = scmp.ne.s32.totalorder %s871_s19, %s867_s18  ;;  %p1109_p1 = scmp.eq.s32.totalorder %s940_s22, 0 }
   0x8   : > { %p156_p3 = scmp.eq.s32.totalorder %s571_s23, 1  ;;  %p572_p5 = scmp.ge.s32.totalorder %s879_s21, 1 }
   0x9   : > { %p949_p4 = por %p1109_p1, %p42_p0  ;;  %p163_p7 = scmp.lt.s32.totalorder %s879_s21, 3 }
   0xa   : > { %p954_p6 = por %p156_p3, %p42_p0  ;;  %s881_s27 = smov [#allocation5]  }
   0xb   : > { %s1113_s24 = scalar_select %p949_p4, 1, 0 }
   0xc   : > { %s1114_s25 = scalar_select %p954_p6, 1, 0 }
   0xd   : > { %p959_p8 = pnand %p572_p5, %p163_p7  ;;  %s175_s28 = sshll.u32 %s881_s27, 4  ;;  %s176_s28 = int_to_ptr.vmem [resolvable:$true] %s175_s28 }
   0xe   : > { %s882_s30 = smov [#allocation7]   ;;  %s742_s7 = scalar_lea.vmem %s176_s28, 512 }
   0xf   : > { %s1115_s26 = scalar_select %p959_p8, 1, 0 }
  0x10   : > { %p660_p9 = pneg %p959_p8  ;;  %s191_s6 = sshll.u32 %s882_s30, 4  ;;  %s192_s6 = int_to_ptr.vmem [resolvable:$true] %s191_s6 }
  0x11   : > { %p743_p13 = scmp.ne.s32.totalorder %s176_s28, %s742_s7  ;;  %p750_p5 = scmp.lt.s32.totalorder %s176_s28, %s176_s28 }
  0x12   : > { %p968_p11 = pnand %p660_p9, %p1109_p1  ;;  %p751_p7 = scmp.lt.s32.totalorder %s742_s7, %s742_s7 }
  0x14   : > { %p733_p12 = pneg %p968_p11  ;;  %p752_p10 = por %p751_p7, %p750_p5 }
  0x16   : > { %p745_p0 = pnand %p743_p13, %p733_p12 }
  0x18   : > { %p746_p3 = pneg %p745_p0 }
  0x1a   : > { %p753_p9 = pnand %p752_p10, %p746_p3 }
  0x1c   : > { %756 = shalt.err (!%p753_p9)
}
  0x1d   : > { %s883_s8 = smov 64   ;;  %s884_s9 = smov 4  }
  0x1e   : > { %663 = dma.hbm_to_vmem [thread:$0]  (!%p968_p11), %s1104_s1, 512, %s176_s28, [#allocation6], %s883_s8, %s883_s8, %s884_s9  }
  0x1f   : > { %s768_s12 = scalar_lea.vmem %s192_s6, 1024  ;;  %p776_p2 = scmp.lt.s32.totalorder %s192_s6, %s192_s6 }
  0x20   : > { %p769_p1 = scmp.ne.s32.totalorder %s192_s6, %s768_s12  ;;  %p777_p6 = scmp.lt.s32.totalorder %s768_s12, %s768_s12 }
  0x22   : > { %p771_p13 = pnand %p769_p1, %p733_p12  ;;  %p778_p5 = por %p777_p6, %p776_p2 }
  0x24   : > { %p772_p0 = pneg %p771_p13 }
  0x26   : > { %p779_p10 = pnand %p778_p5, %p772_p0 }
  0x28   : > { %782 = shalt.err (!%p779_p10)
}
  0x29   : > { %666 = dma.hbm_to_vmem [thread:$0]  (!%p968_p11), %s1106_s3, 1024, %s192_s6, [#allocation6], %s883_s8, %s883_s8, %s884_s9  }
  0x2a   : > { %s991_s15 = sadd.s32 1, %s879_s21   ;;  %s29_s16 = sadd.s32 1, %s875_s20 }
  0x2b   : > { %s26_s17 = ssub.s32 %s879_s21, %s991_s15  ;;  %p36_p1 = scmp.ne.s32.totalorder %s875_s20, %s871_s19 }
  0x2c   : > { %p27_p2 = scmp.eq.s32.totalorder %s26_s17, 0  ;;  %p37_p6 = scmp.eq.s32.totalorder %s879_s21, 0 }
  0x2d   : > { %p1117_p12 = scmp.eq.s32.totalorder %s940_s22, 1  ;;  %p677_p7 = scmp.lt.s32.totalorder %s879_s21, 2 }
  0x2e   : > { %s1007_s27 = scalar_select %p27_p2, %s875_s20, %s29_s16  }
  0x2f   : > { %p1001_p3 = por %p1117_p12, %p36_p1  ;;  %p38_p9 = por %p37_p6, %p36_p1 }
  0x30   : > { %s208_s28 = sand.u32 1, %s875_s20   ;;  %s577_s30 = sshll.u32 %s879_s21, 6 }
  0x31   : > { %s1118_s23 = scalar_select %p1001_p3, 1, 0 }
  0x32   : > { %s576_s29 = sshll.u32 %s208_s28, 2  ;;  %s1014_s8 = scalar_lea.hbm %s1103_s0, %s577_s30 }
  0x33   : > { %s212_s9 = scalar_lea.vmem [#allocation2], %s576_s29  ;;  %p1016_p11 = pnand %p677_p7, %p38_p9 }
  0x34   : > { %s219_s10 = sshll.u32 %s212_s9, 4  ;;  %s209_s12 = scalar_lea.sflag [#allocation3], %s208_s28  ;;  %s220_s10 = int_to_ptr.vmem [resolvable:$true] %s219_s10 }
  0x35   : > { %s783_s13 = scalar_lea.hbm %s1014_s8, 64  ;;  %p785_p0 = pneg %p1016_p11 }
  0x36   : > { %p784_p13 = scmp.ne.s32.totalorder %s1014_s8, %s783_s13  ;;  %s788_s17 = scalar_lea.hbm %s1103_s0, 128 }
  0x37   : > { %p789_p1 = scmp.lt.s32.totalorder %s1014_s8, %s1103_s0  ;;  %p790_p2 = scmp.lt.s32.totalorder %s788_s17, %s783_s13 }
  0x38   : > { %p786_p5 = pnand %p785_p0, %p784_p13 }
  0x39   : > { %p791_p6 = por %p790_p2, %p789_p1 }
  0x3a   : > { %p787_p10 = pneg %p786_p5 }
  0x3c   : > { %p792_p12 = pnand %p791_p6, %p787_p10 }
  0x3e   : > { %795 = shalt.err (!%p792_p12)
}
  0x3f   : > { %s796_s6 = scalar_lea.vmem %s220_s10, 64  ;;  %s885_s28 = smov [#allocation2]  }
  0x40   : > { %p797_p7 = scmp.ne.s32.totalorder %s220_s10, %s796_s6  ;;  %s801_s7 = sshll.u32 %s885_s28, 4  ;;  %s802_s7 = int_to_ptr.vmem [resolvable:$false] %s801_s7 }
  0x41   : > { %s803_s9 = scalar_lea.vmem %s802_s7, 128  ;;  %p804_p13 = scmp.lt.s32.totalorder %s220_s10, %s802_s7 }
  0x42   : > { %p799_p9 = pnand %p797_p7, %p785_p0  ;;  %p805_p5 = scmp.lt.s32.totalorder %s803_s9, %s796_s6 }
  0x44   : > { %p800_p3 = pneg %p799_p9  ;;  %p806_p4 = por %p805_p5, %p804_p13 }
  0x46   : > { %p807_p8 = pnand %p806_p4, %p800_p3 }
  0x48   : > { %810 = shalt.err (!%p807_p8)
}
  0x49   : > { %670 = dma.hbm_to_vmem [thread:$0]  (!%p1016_p11), %s1014_s8, 64, %s220_s10, %s209_s12  }
  0x4a   : > { %p1120_p10 = scmp.ne.s32.totalorder %s1115_s26, 0 }
  0x4b   : > { %s1037_s13 = sand.u32 (!%p1120_p10), 1, %s871_s19   ;;  %p1121_p0 = scmp.ne.s32.totalorder (!%p1120_p10), %s1113_s24, 0 }
  0x4c   : > { %228 = sbr.rel (%p1120_p10) target bundleno = 511 (0x1ff), region = 40  ;;  %s579_s14 = sshll.u32 (!%p1120_p10), %s1037_s13, 2 }
  0x4d   : > { %s231_s16 = scalar_lea.sflag (!%p1120_p10), [#allocation3], %s1037_s13  ;;  %s234_s17 = scalar_lea.vmem (!%p1120_p10), [#allocation2], %s579_s14 }
  0x51   : > { %854 = dma.done.wait (%p1121_p0), %s231_s16, 64  }
  0x52   : > { %856 = vsyncadd (%p1121_p0), %s231_s16, 4294967232  ;;  %p1122_p4 = scmp.eq.s32.totalorder %s940_s22, 0 }
  0x54   : > { %858 = dma.done.wait (%p1122_p4), [#allocation6], 1536   ;;  %p1123_p8 = pmov %p1122_p4 }
  0x55   : > { %v886_v0 = vmov 0.0   ;;  %vm887_vm0 = vmmov 0   ;;  %v719_v1 = vld [vmem:[#allocation5 + $0x18] sm:$0xff]   ;;  %v720_v2 = vld [vmem:[#allocation5 + $0x10] sm:$0xff]   ;;  %v721_v4 = vld [vmem:[#allocation5 + $0x8] sm:$0xff]   ;;  %vm310_vm1 = vcmask 523264  }
  0x56   : > { %860 = vsyncadd (%p1123_p8), [#allocation6], 4294965760  ;;  %616 = vmatprep.subr.bf16.mxu0 %v886_v0  ;;  %624 = vmatprep.mubr.msk.bf16.mxu0 %vm887_vm0, %v886_v0  ;;  %v723_v3 = vld [vmem:[#allocation7 + $0x38] sm:$0xff]   ;;  %v724_v5 = vld [vmem:[#allocation7 + $0x30] sm:$0xff]   ;;  %s582_s8 = sshll.u32 %s1037_s13, 3  ;;  %s599_s12 = sshll.u32 %s940_s22, 7 }
  0x57   : > { %628 = vmatprep.subr.bf16.mxu1 %v886_v0  ;;  %644 = vmatprep.mubr.msk.bf16.mxu1 %vm887_vm0, %v886_v0  ;;  %v722_v6 = vld [vmem:[#allocation5] sm:$0xff]   ;;  %v725_v7 = vld [vmem:[#allocation7 + $0x28] sm:$0xff]   ;;  %v270_v8 = vld [vmem:[%s234_s17] sm:$0xf]  ;;  %s268_s30 = scalar_lea.vmem [#allocation8], %s582_s8  ;;  %s1060_s7 = scalar_lea.hbm %s1108_s5, %s599_s12 }
  0x58   : > { %617 = vmatpush3.bf16.msra.mxu0 %v719_v1  ;;  %629 = vmatpush3.bf16.msra.mxu1 %v723_v3  ;;  %v726_v9 = vld [vmem:[#allocation7 + $0x20] sm:$0xff]   ;;  %v727_v10 = vld [vmem:[#allocation7 + $0x18] sm:$0xff]   ;;  %v728_v11 = vld [vmem:[#allocation7 + $0x10] sm:$0xff]   ;;  %s482_s29 = sshll.u32 %s268_s30, 4  ;;  %s469_s9 = scalar_lea.sflag [#allocation4], %s1037_s13  ;;  %s1062_s29 = int_to_ptr.vmem [resolvable:$true] %s482_s29 }
  0x59   : > { %618 = vmatprep.subr.bf16.mxu0 %v886_v0  ;;  %630 = vmatprep.subr.bf16.mxu1 %v886_v0  ;;  %v729_v12 = vld [vmem:[#allocation7 + $0x8] sm:$0xff]   ;;  %v730_v13 = vld [vmem:[#allocation7] sm:$0xff]   ;;  %v583_v14 = vld [vmem:[%s1105_s2] ss:$0 sm:$0xff]  ;;  %s811_s14 = scalar_lea.vmem %s1062_s29, 128  ;;  %p1124_p11 = scmp.ne.s32.totalorder %s1118_s23, 0 }
  0x5a   : > { %v589_v22 = vld [vmem:[%s1107_s4] ss:$0 sm:$0xff]  ;;  %p812_p3 = scmp.ne.s32.totalorder %s1062_s29, %s811_s14  ;;  %s888_s22 = smov [#allocation8]  }
  0x5b   : > { %s815_s16 = sshll.u32 %s888_s22, 4  ;;  %s816_s16 = int_to_ptr.vmem [resolvable:$false] %s815_s16 }
  0x5c   : > { %619 = vmatpush3.bf16.msra.mxu0 %v720_v2  ;;  %631 = vmatpush3.bf16.msra.mxu1 %v724_v5  ;;  %p813_p1 = pnand %p812_p3, %p1124_p11  ;;  %s817_s17 = scalar_lea.vmem %s816_s16, 256 }
  0x5d   : > { %620 = vmatprep.subr.bf16.mxu0 %v886_v0  ;;  %632 = vmatprep.subr.bf16.mxu1 %v886_v0  ;;  %p818_p6 = scmp.lt.s32.totalorder %s1062_s29, %s816_s16  ;;  %p819_p12 = scmp.lt.s32.totalorder %s817_s17, %s811_s14 }
  0x5e   : > { %p814_p2 = pneg %p813_p1 }
  0x5f   : > { %p820_p7 = por %p819_p12, %p818_p6 }
  0x60   : > { %621 = vmatpush3.bf16.msra.mxu0 %v721_v4  ;;  %633 = vmatpush3.bf16.msra.mxu1 %v725_v7 }
  0x61   : > { %622 = vmatprep.subr.bf16.mxu0 %v886_v0  ;;  %634 = vmatprep.subr.bf16.mxu1 %v886_v0  ;;  %p821_p9 = pnand %p820_p7, %p814_p2 }
  0x64   : > { %623 = vmatpush3.bf16.msra.mxu0 %v722_v6  ;;  %635 = vmatpush3.bf16.msra.mxu1 %v726_v9 }
  0x65   : > { %636 = vmatprep.subr.bf16.mxu1 %v886_v0 }
  0x67   : > { %625 = vmatmul.mubr.msk.bf16.vlgmr.msra.gmra.mxu0 %vm310_vm1, %v270_v8 }
  0x68   : > { %637 = vmatpush3.bf16.msra.mxu1 %v727_v10 }
  0x69   : > { %638 = vmatprep.subr.bf16.mxu1 %v886_v0 }
  0x6c   : > { %639 = vmatpush3.bf16.msra.mxu1 %v728_v11 }
  0x6d   : > { %640 = vmatprep.subr.bf16.mxu1 %v886_v0 }
  0x70   : > { %641 = vmatpush3.bf16.msra.mxu1 %v729_v12 }
  0x71   : > { %642 = vmatprep.subr.bf16.mxu1 %v886_v0 }
  0x74   : > { %643 = vmatpush3.bf16.msra.mxu1 %v730_v13 }
 0x127   : > { %v348_v15 = vpop.f32.mrf.mxu0 }
 0x128   : > { %v349_v16 = vadd.f32 %v583_v14, %v348_v15 }
 0x129   : > { %v626_v17 = vpop.f32.mrf.mxu0 }
 0x12a   : > { %v354_v18 = vmax.f32 %v349_v16, 0.0 }
 0x12b   : > { %v351_v19 = vpop.f32.mrf.mxu0 }
 0x12c   : > { %v355_v20 = vpack.c.bf16 %v354_v18, %v354_v18 }
 0x12d   : > { %v627_v21 = vpop.f32.mrf.mxu0 }
 0x12e   : > { %645 = vmatmul.mubr.bf16.vlgmr.msra.gmra.mxu1 %v355_v20 }
 0x1ee   : > { %v461_v23 = vpop.f32.mrf.mxu1 }
 0x1ef   : > { %v462_v24 = vadd.f32 %v589_v22, %v461_v23 }
 0x1f0   : > { %v646_v25 = vpop.f32.mrf.mxu1 }
 0x1f1   : > { %467 = vst [vmem:[%s268_s30] sm:$0xff] %v462_v24 }
 0x1f2   : > { %v464_v26 = vpop.f32.mrf.mxu1 }
 0x1f3   : > { %824 = shalt.err (!%p821_p9)
}
 0x1f4   : > { %s825_s24 = scalar_lea.hbm %s1060_s7, 128  ;;  %s829_s8 = scalar_lea.hbm %s1108_s5, 256 }
 0x1f5   : > { %p826_p13 = scmp.ne.s32.totalorder %s1060_s7, %s825_s24  ;;  %p830_p0 = scmp.lt.s32.totalorder %s1060_s7, %s1108_s5 }
 0x1f6   : > { %p831_p4 = scmp.lt.s32.totalorder %s829_s8, %s825_s24 }
 0x1f7   : > { %p827_p5 = pnand %p826_p13, %p1124_p11 }
 0x1f8   : > { %p832_p8 = por %p831_p4, %p830_p0 }
 0x1f9   : > { %p828_p10 = pneg %p827_p5 }
 0x1fb   : > { %p833_p3 = pnand %p832_p8, %p828_p10 }
 0x1fd   : > { %836 = shalt.err (!%p833_p3)
}
 0x1fe   : > { %658 = dma.vmem_to_hbm [thread:$0]  (%p1124_p11), %s1062_s29, 128, %s1060_s7, %s469_s9   ;;  %v647_v27 = vpop.f32.mrf.mxu1 }
 0x1ff PF: > { %s494_s12 = sand.u32 1, %s867_s18   ;;  %p1125_p1 = scmp.ne.s32.totalorder %s1114_s25, 0 }
 0x200   : > { %p1126_p2 = scmp.ge.s32.totalorder %s879_s21, 2  ;;  %s495_s30 = scalar_lea.sflag [#allocation4], %s494_s12 }
 0x202   : > { %p672_p6 = pnand %p1126_p2, %p1125_p1 }
 0x204   : > { %p673_p12 = pneg %p672_p6 }
 0x206   : > { %862 = dma.done.wait (%p673_p12), %s495_s30, 128  }
 0x207   : > { %864 = vsyncadd (%p673_p12), %s495_s30, 4294967168  ;;  %p19_p7 = scmp.ge.s32.totalorder %s991_s15, 4   ;;  %s1127_s18 = smov %s871_s19 }
 0x208   : > { %s1128_s19 = smov %s875_s20  ;;  %s1129_s20 = smov %s1007_s27 }
 0x209   : > { %s1130_s21 = smov %s991_s15  ;;  %21 = sbr.rel (!%p19_p7) target bundleno = 6 (0x6), region = 93 }
 0x20e   :  { %500 = vsyncpa [#allocation3], 1 }
 0x20f   :  { %502 = vsyncpa [#allocation3 + $0x1], 1 }
 0x210   :  { %503 = vsyncpa [#allocation6], 1 }
 0x211   :  { %504 = vsyncpa [#allocation4], 1 }
 0x212   :  { %506 = vsyncpa [#allocation4 + $0x1], 1 }

</bundles_post_ra>
